<compile_context>
chip_gen: v5e
topology: v5e:2x2
jax: 0.10.0
libtpu: 0.0.40
codegen_flags: <defaults>
</compile_context>

<pallas_src>
import math

import jax
import jax.numpy as jnp
from jax.experimental import pallas as pl
from jax.experimental.pallas import tpu as pltpu

MP_WORLD_SIZE = 2  # simulated dist.get_world_size(group=_MODEL_PARALLEL_GROUP)


def _round_up(x: int, m: int) -> int:
    return ((x + m - 1) // m) * m


def _sublane_multiple(dtype) -> int:
    # Minimum second-to-last-dim tile: 8 (f32), 16 (bf16), 32 (int8 / fp8).
    return max(8, 32 // jnp.dtype(dtype).itemsize)


def _pick_tile(dim_padded: int, want: int, align: int) -> int:
    """Largest multiple of `align` that is <= want and divides dim_padded."""
    t = max(align, (min(want, dim_padded) // align) * align)
    while dim_padded % t != 0:
        t -= align
    return t


def _vmem_capacity_bytes() -> int:
    try:
        info = pltpu.get_tpu_info()
        for name in ("vmem_capacity_bytes", "vmem_size_bytes", "vmem_bytes"):
            v = getattr(info, name, None)
            if v:
                return int(v)
    except Exception:
        pass
    return 64 * 1024 * 1024  # conservative (v7x-sized) default


def pack_cpl_weights(weight, bias):
    """One-time (model init) weight re-layout.

    weight: [N, K] (PyTorch nn.Linear layout), bias: [N].
    Returns (w_kn [Kp, Np], bias2 [1, Np], N) with Np/Kp padded to 128 multiples,
    so per-call padding / transposition of the weight shard never hits HBM again.
    """
    N, K = weight.shape
    Np, Kp = _round_up(N, 128), _round_up(K, 128)
    w = weight
    if (Np, Kp) != (N, K):
        w = jnp.pad(w, ((0, Np - N), (0, Kp - K)))
    w_kn = jnp.transpose(w)  # [Kp, Np] -- plain MXU layout, no in-kernel transpose
    b = bias if Np == N else jnp.pad(bias, (0, Np - N))
    return w_kn, b.reshape(1, Np), N


def _cpl_kernel(x_ref, w_ref, b_ref, o_ref, acc_ref):
    """One (tm, tn) output tile; K is the innermost ('arbitrary') grid axis."""
    k = pl.program_id(2)

    @pl.when(k == 0)
    def _init():
        acc_ref[...] = jnp.zeros_like(acc_ref)

    # x_ref: (tm, tk); w_ref: (tk, tn) -- pre-transposed weight, native MXU matmul.
    acc_ref[...] += jnp.dot(
        x_ref[...], w_ref[...], preferred_element_type=jnp.float32
    )

    @pl.when(k == pl.num_programs(2) - 1)
    def _epilogue():
        # Bias added exactly once, after the full-K accumulation.
        o_ref[...] = (acc_ref[...] + b_ref[...].astype(jnp.float32)).astype(o_ref.dtype)


def column_parallel_linear(x, w_kn, bias2, n_out, *, tm=None, tn=None, tk=None):
    """x: [..., K]; w_kn: [Kp, Np] packed weight; bias2: [1, Np]. Returns [..., n_out]."""
    *lead, K = x.shape
    Kp, Np = w_kn.shape
    x2 = x.reshape(-1, K)  # flatten leading dims (like nn.Linear)
    M = x2.shape[0]

    # --- generation/dtype-aware tile defaults -------------------------------
    vmem_cap = _vmem_capacity_bytes()
    if vmem_cap >= 100 * 1024 * 1024:   # v5e / v6e: 128 MiB VMEM, need high flop/B
        d_tm, d_tn, d_tk = 1024, 2048, 512
    else:                               # v7x: 64 MiB VMEM per TC, 3.2 TB/s HBM
        d_tm, d_tn, d_tk = 512, 1024, 512
    tm = tm or d_tm
    tn = tn or d_tn
    tk = tk or d_tk

    # --- clamp tiles to the problem (dtype-aware sublane alignment) ---------
    sub = _sublane_multiple(x.dtype)
    tm = max(sub, (min(tm, _round_up(M, sub)) // sub) * sub)
    Mp = _round_up(M, tm)
    tn = _pick_tile(Np, tn, 128)
    tk = _pick_tile(Kp, tk, 128)

    if Mp // tm == 1:
        # Decode-shaped: weight-bandwidth-bound. Stream bigger K chunks per grid
        # step (fewer, larger DMAs; less ~0.35us/step overhead).
        tk = _pick_tile(Kp, max(tk, min(Kp, 2048)), 128)
        # If both parallel axes collapsed to one tile, split N so a second
        # TensorCore (v7x megacore) has work; cheap elsewhere.
        if Np // tn == 1 and Np >= 256:
            tn = _pick_tile(Np, Np // 2, 128)

    grid = (Mp // tm, Np // tn, Kp // tk)

    # Pad activations only (weight/bias were padded once at init).
    if (Mp, Kp) != (M, K):
        x2 = jnp.pad(x2, ((0, Mp - M), (0, Kp - K)))

    # Triple-buffer the weight stream on decode-shaped calls with a real K loop.
    w_spec_kwargs = {}
    w_bufs = 2
    if grid[0] == 1 and grid[2] > 1:
        w_spec_kwargs["pipeline_mode"] = pl.Buffered(3)
        w_bufs = 3
    w_spec = pl.BlockSpec((tk, tn), lambda i, j, k: (k, j), **w_spec_kwargs)

    # Scoped VMEM limit derived from the actual working set (<= 75% of physical).
    isz = x2.dtype.itemsize
    working = (
        2 * tm * tk * isz                       # x double buffer
        + w_bufs * tk * tn * w_kn.dtype.itemsize  # weight buffers
        + 2 * tm * tn * isz                     # output double buffer
        + 2 * tn * bias2.dtype.itemsize         # bias double buffer
        + tm * tn * 4                           # f32 accumulator scratch
    )
    vmem_limit = min(max(int(working * 1.5), 32 * 1024 * 1024),
                     int(0.75 * vmem_cap))

    # Cost estimate reflecting re-reads under this tiling: x is read Np/tn times,
    # the weight shard is read Mp/tm times.
    n_i, n_j = grid[0], grid[1]
    cost = pl.CostEstimate(
        flops=2 * M * K * n_out,
        transcendentals=0,
        bytes_accessed=(
            x2.size * x2.dtype.itemsize * n_j
            + w_kn.size * w_kn.dtype.itemsize * n_i
            + bias2.size * bias2.dtype.itemsize * n_i
            + Mp * Np * x.dtype.itemsize
        ),
    )

    out = pl.pallas_call(
        _cpl_kernel,
        out_shape=jax.ShapeDtypeStruct((Mp, Np), x.dtype),
        grid_spec=pltpu.PrefetchScalarGridSpec(
            num_scalar_prefetch=0,
            grid=grid,
            in_specs=[
                pl.BlockSpec((tm, tk), lambda i, j, k: (i, k)),   # activations
                w_spec,                                           # weight [Kp, Np]
                pl.BlockSpec((1, tn), lambda i, j, k: (0, j)),    # bias slice
            ],
            out_specs=pl.BlockSpec((tm, tn), lambda i, j, k: (i, j)),
            scratch_shapes=[pltpu.VMEM((tm, tn), jnp.float32)],   # f32 accumulator
        ),
        compiler_params=pltpu.CompilerParams(
            dimension_semantics=("parallel", "parallel", "arbitrary"),
            vmem_limit_bytes=vmem_limit,
        ),
        cost_estimate=cost,
    )(x2, w_kn, bias2)

    return out[:M, :n_out].reshape(*lead, n_out)


if __name__ == "__main__":
    input_dim = 32
    output_dim = 64
    assert output_dim % MP_WORLD_SIZE == 0
    out_per_part = output_dim // MP_WORLD_SIZE  # 32

    batch, seq = 2, 8
    key = jax.random.PRNGKey(0)
    kx, kw, kb = jax.random.split(key, 3)

    # Deterministic PyTorch-style init: U(-1/sqrt(in), 1/sqrt(in)) for weight and bias.
    bound = 1.0 / math.sqrt(input_dim)
    weight = jax.random.uniform(kw, (out_per_part, input_dim), jnp.float32,
                                minval=-bound, maxval=bound)
    bias = jax.random.uniform(kb, (out_per_part,), jnp.float32,
                              minval=-bound, maxval=bound)
    x = jax.random.normal(kx, (batch, seq, input_dim), jnp.float32)

    # One-time (init) weight packing: pad + transpose to [Kp, Np].
    w_kn, bias2, n_out = pack_cpl_weights(weight, bias)

    out = jax.block_until_ready(column_parallel_linear(x, w_kn, bias2, n_out))

    # Reference check (plain JAX) for the local-shard linear.
    ref = x @ weight.T + bias
    assert out.shape == (batch, seq, out_per_part)
    assert jnp.allclose(out, ref, atol=1e-5, rtol=1e-5)

    print("KERNEL_OK")
</pallas_src>

<mosaic_0001>
module attributes {stable_mosaic.version = 11 : i64} {
  func.func @_cpl_kernel(%arg0: i32, %arg1: i32, %arg2: i32, %arg3: memref<16x128xf32, #tpu.memory_space<vmem>>, %arg4: memref<128x128xf32, #tpu.memory_space<vmem>>, %arg5: memref<1x128xf32, #tpu.memory_space<vmem>>, %arg6: memref<16x128xf32, #tpu.memory_space<vmem>>, %arg7: memref<16x128xf32, #tpu.memory_space<vmem>>) attributes {dimension_semantics = [#tpu.dimension_semantics<parallel>, #tpu.dimension_semantics<parallel>, #tpu.dimension_semantics<arbitrary>], iteration_bounds = array<i64: 1, 1, 1>, scalar_prefetch = 0 : i64, scratch_operands = 1 : i64, tpu.core_type = #tpu.core_type<tc>, window_params = [{transform_indices = @transform_0, window_bounds = array<i64: 16, 128>}, {transform_indices = @transform_1, window_bounds = array<i64: 128, 128>}, {transform_indices = @transform_2, window_bounds = array<i64: 1, 128>}, {transform_indices = @transform_3, window_bounds = array<i64: 16, 128>}]} {
    %c0_i32 = arith.constant 0 : i32
    %0 = arith.cmpi eq, %arg2, %c0_i32 : i32
    %1 = arith.extui %0 : i1 to i32
    %c0_i32_0 = arith.constant 0 : i32
    %2 = arith.cmpi ne, %1, %c0_i32_0 : i32
    scf.if %2 {
      %cst_10 = arith.constant 0.000000e+00 : f32
      %12 = vector.broadcast %cst_10 : f32 to vector<16x128xf32>
      %c0_11 = arith.constant 0 : index
      %c0_12 = arith.constant 0 : index
      %13 = vector.load %arg7[%c0_11, %c0_12] : memref<16x128xf32, #tpu.memory_space<vmem>>, vector<16x128xf32>
      tpu.vector_store %arg7[%c0_11, %c0_12], %12 {strides = array<i32>} : memref<16x128xf32, #tpu.memory_space<vmem>>, vector<16x128xf32>,
    } else {
    }
    %c0 = arith.constant 0 : index
    %c0_1 = arith.constant 0 : index
    %3 = vector.load %arg7[%c0, %c0_1] : memref<16x128xf32, #tpu.memory_space<vmem>>, vector<16x128xf32>
    %c0_2 = arith.constant 0 : index
    %c0_3 = arith.constant 0 : index
    %4 = vector.load %arg3[%c0_2, %c0_3] : memref<16x128xf32, #tpu.memory_space<vmem>>, vector<16x128xf32>
    %c0_4 = arith.constant 0 : index
    %c0_5 = arith.constant 0 : index
    %5 = vector.load %arg4[%c0_4, %c0_5] : memref<128x128xf32, #tpu.memory_space<vmem>>, vector<128x128xf32>
    %cst = arith.constant dense<0.000000e+00> : vector<16x128xf32>
    %6 = tpu.matmul %4, %5, %cst {dimension_numbers = #tpu.dot_dimension_numbers<[1], [0], [0], [1], [0, 0, 1, 1], [], []>} : vector<16x128xf32>, vector<128x128xf32>, vector<16x128xf32> -> vector<16x128xf32>
    %7 = arith.addf %3, %6 : vector<16x128xf32>
    %c0_6 = arith.constant 0 : index
    %c0_7 = arith.constant 0 : index
    %8 = vector.load %arg7[%c0_6, %c0_7] : memref<16x128xf32, #tpu.memory_space<vmem>>, vector<16x128xf32>
    tpu.vector_store %arg7[%c0_6, %c0_7], %7 {strides = array<i32>} : memref<16x128xf32, #tpu.memory_space<vmem>>, vector<16x128xf32>,
    %c0_i32_8 = arith.constant 0 : i32
    %9 = arith.cmpi eq, %arg2, %c0_i32_8 : i32
    %10 = arith.extui %9 : i1 to i32
    %c0_i32_9 = arith.constant 0 : i32
    %11 = arith.cmpi ne, %10, %c0_i32_9 : i32
    scf.if %11 {
      %c0_10 = arith.constant 0 : index
      %c0_11 = arith.constant 0 : index
      %12 = vector.load %arg7[%c0_10, %c0_11] : memref<16x128xf32, #tpu.memory_space<vmem>>, vector<16x128xf32>
      %c0_12 = arith.constant 0 : index
      %c0_13 = arith.constant 0 : index
      %13 = vector.load %arg5[%c0_12, %c0_13] : memref<1x128xf32, #tpu.memory_space<vmem>>, vector<1x128xf32>
      %14 = vector.broadcast %13 : vector<1x128xf32> to vector<16x128xf32>
      %15 = arith.addf %12, %14 : vector<16x128xf32>
      %c0_14 = arith.constant 0 : index
      %c0_15 = arith.constant 0 : index
      %16 = vector.load %arg6[%c0_14, %c0_15] : memref<16x128xf32, #tpu.memory_space<vmem>>, vector<16x128xf32>
      tpu.vector_store %arg6[%c0_14, %c0_15], %15 {strides = array<i32>} : memref<16x128xf32, #tpu.memory_space<vmem>>, vector<16x128xf32>,
    } else {
    }
    return
  }
  func.func @transform_0(%arg0: i32, %arg1: i32, %arg2: i32) -> (i32, i32) {
    %c0_i32 = arith.constant 0 : i32
    return %arg0, %arg2 : i32, i32
  }
  func.func @transform_1(%arg0: i32, %arg1: i32, %arg2: i32) -> (i32, i32) {
    %c0_i32 = arith.constant 0 : i32
    return %arg2, %arg1 : i32, i32
  }
  func.func @transform_2(%arg0: i32, %arg1: i32, %arg2: i32) -> (i32, i32) {
    %c0_i32 = arith.constant 0 : i32
    %c0_i32_0 = arith.constant 0 : i32
    return %c0_i32, %arg1 : i32, i32
  }
  func.func @transform_3(%arg0: i32, %arg1: i32, %arg2: i32) -> (i32, i32) {
    %c0_i32 = arith.constant 0 : i32
    return %arg0, %arg1 : i32, i32
  }
}

</mosaic_0001>

<bundles_post_ra>
// kernel: tpu_custom_call.1
= control target key start
LH: loop header
LB: loop body
LE: loop exit
PB: predicated region body
PF: predicated region fallthrough
CT: control target
= control target key end

     0   :  { %8 = vsyncpa [#allocation4], 0  ;;  %s279_s0 = inlined_call_operand.hbm [shape: f32[16,128], index: 0, kind: input, shape index: {}]   ;;  %s280_s1 = inlined_call_operand.hbm [shape: f32[128,128], index: 1, kind: input, shape index: {}]   ;;  %s281_s2 = inlined_call_operand.vmem [shape: f32[1,128], index: 2, kind: input, shape index: {}]   ;;  %s282_s3 = inlined_call_operand.hbm [shape: f32[16,128], index: 3, kind: output, shape index: {}]  }
   0x1   :  { %9 = vsyncpa [#allocation7], 0 }
   0x2   :  { %10 = vsyncpa [#allocation5], 0  ;;  %s15_s14 = sshll.u32 %s279_s0, 4  ;;  %s233_s15 = smov [#allocation3]   ;;  %s16_s14 = int_to_ptr.hbm [resolvable:$true] %s15_s14 }
   0x3   :  { %s17_s16 = sshll.u32 %s233_s15, 4  ;;  %s28_s19 = sshll.u32 %s280_s1, 4  ;;  %s18_s16 = int_to_ptr.vmem [resolvable:$true] %s17_s16  ;;  %s29_s19 = int_to_ptr.hbm [resolvable:$true] %s28_s19 }
   0x4   :  { %s234_s20 = smov 128   ;;  %s235_s21 = smov 8  }
   0x5   :  { %23 = dma.hbm_to_vmem [thread:$0]  %s16_s14, 256, %s18_s16, [#allocation4], %s234_s20, %s234_s20, %s235_s21  }
   0x6   :  { %s236_s22 = smov [#allocation6]  }
   0x7   :  { %s30_s23 = sshll.u32 %s236_s22, 4  ;;  %s31_s23 = int_to_ptr.vmem [resolvable:$true] %s30_s23 }
   0x8   :  { %36 = dma.hbm_to_vmem [thread:$0]  %s29_s19, 2048, %s31_s23, [#allocation7], %s234_s20, %s234_s20, %s235_s21  }
   0x9   :  { %227 = dma.done.wait [#allocation4], 256  }
   0xa   :  { %228 = vsyncadd [#allocation4], 4294967040 }
   0xb   :  { %229 = dma.done.wait [#allocation7], 2048  }
   0xc   :  { %230 = vsyncadd [#allocation7], 4294965248  ;;  %v72_v0 = vld [vmem:[#allocation6 + $0x78] sm:$0xff]  ;;  %v71_v1 = vld [vmem:[#allocation6 + $0x70] sm:$0xff]  ;;  %s237_s24 = smov [#allocation8]   ;;  %s119_s28 = sshll.u32 %s282_s3, 4  ;;  %s120_s28 = int_to_ptr.hbm [resolvable:$true] %s119_s28 }
   0xd   :  { %73 = vmatpush.msra.mxu0 %v72_v0  ;;  %133 = vmatpush.msra.mxu1 %v72_v0  ;;  %v70_v2 = vld [vmem:[#allocation6 + $0x68] sm:$0xff]  ;;  %v69_v3 = vld [vmem:[#allocation6 + $0x60] sm:$0xff]  ;;  %v68_v4 = vld [vmem:[#allocation6 + $0x58] sm:$0xff]  ;;  %s117_s25 = sshll.u32 %s237_s24, 4  ;;  %s118_s25 = int_to_ptr.vmem [resolvable:$true] %s117_s25 }
   0xe   :  { %v67_v5 = vld [vmem:[#allocation6 + $0x50] sm:$0xff]  ;;  %v66_v6 = vld [vmem:[#allocation6 + $0x48] sm:$0xff]  ;;  %v65_v7 = vld [vmem:[#allocation6 + $0x40] sm:$0xff] }
   0xf   :  { %74 = vmatpush.msra.mxu0 %v71_v1  ;;  %134 = vmatpush.msra.mxu1 %v71_v1  ;;  %v64_v8 = vld [vmem:[#allocation6 + $0x38] sm:$0xff]  ;;  %v63_v9 = vld [vmem:[#allocation6 + $0x30] sm:$0xff]  ;;  %v62_v10 = vld [vmem:[#allocation6 + $0x28] sm:$0xff] }
  0x10   :  { %v61_v11 = vld [vmem:[#allocation6 + $0x20] sm:$0xff]  ;;  %v60_v12 = vld [vmem:[#allocation6 + $0x18] sm:$0xff]  ;;  %v59_v13 = vld [vmem:[#allocation6 + $0x10] sm:$0xff] }
  0x11   :  { %75 = vmatpush.msra.mxu0 %v70_v2  ;;  %135 = vmatpush.msra.mxu1 %v70_v2  ;;  %v58_v14 = vld [vmem:[#allocation6 + $0x8] sm:$0xff]  ;;  %v57_v15 = vld [vmem:[#allocation6] sm:$0xff]  ;;  %v55_v16 = vld [vmem:[#allocation3] sm:$0xff] }
  0x12   :  { %v56_v17 = vld [vmem:[#allocation3 + $0x8] sm:$0xff]  ;;  %v154_v18 = vld [vmem:[%s281_s2] ss:$0 sm:$0xff] }
  0x13   :  { %76 = vmatpush.msra.mxu0 %v69_v3  ;;  %136 = vmatpush.msra.mxu1 %v69_v3 }
  0x15   :  { %77 = vmatpush.msra.mxu0 %v68_v4  ;;  %137 = vmatpush.msra.mxu1 %v68_v4 }
  0x17   :  { %78 = vmatpush.msra.mxu0 %v67_v5  ;;  %138 = vmatpush.msra.mxu1 %v67_v5 }
  0x19   :  { %79 = vmatpush.msra.mxu0 %v66_v6  ;;  %139 = vmatpush.msra.mxu1 %v66_v6 }
  0x1b   :  { %80 = vmatpush.msra.mxu0 %v65_v7  ;;  %140 = vmatpush.msra.mxu1 %v65_v7 }
  0x1d   :  { %81 = vmatpush.msra.mxu0 %v64_v8  ;;  %141 = vmatpush.msra.mxu1 %v64_v8 }
  0x1f   :  { %82 = vmatpush.msra.mxu0 %v63_v9  ;;  %142 = vmatpush.msra.mxu1 %v63_v9 }
  0x21   :  { %83 = vmatpush.msra.mxu0 %v62_v10  ;;  %143 = vmatpush.msra.mxu1 %v62_v10 }
  0x23   :  { %84 = vmatpush.msra.mxu0 %v61_v11  ;;  %144 = vmatpush.msra.mxu1 %v61_v11 }
  0x25   :  { %85 = vmatpush.msra.mxu0 %v60_v12  ;;  %145 = vmatpush.msra.mxu1 %v60_v12 }
  0x27   :  { %86 = vmatpush.msra.mxu0 %v59_v13  ;;  %146 = vmatpush.msra.mxu1 %v59_v13 }
  0x29   :  { %87 = vmatpush.msra.mxu0 %v58_v14  ;;  %147 = vmatpush.msra.mxu1 %v58_v14 }
  0x2b   :  { %88 = vmatpush.msra.mxu0 %v57_v15  ;;  %148 = vmatpush.msra.mxu1 %v57_v15 }
  0x2c   :  { %89 = vmatmul.f32.vlgmr.msra.gmra.mxu0 %v55_v16  ;;  %92 = vmatmul.f32.vlgmr.msra.gmra.mxu1 %v56_v17 }
  0xa9   :  { %v90_v19 = vpop.f32.mrf.mxu0  ;;  %v93_v20 = vpop.f32.mrf.mxu1 }
  0xaa   :  { %v109_v21 = vadd.f32 %v154_v18, %v90_v19  ;;  %v110_v22 = vadd.f32 %v154_v18, %v93_v20 }
  0xac   :  { %111 = vst [vmem:[#allocation8] sm:$0xff] %v109_v21 }
  0xad   :  { %112 = vst [vmem:[#allocation8 + $0x8] sm:$0xff] %v110_v22 }
  0xae   :  { %125 = dma.vmem_to_hbm [thread:$0]  %s118_s25, 256, %s120_s28, [#allocation5], %s234_s20, %s234_s20, %s235_s21  }
  0xaf   :  { %231 = dma.done.wait [#allocation5], 256  }
  0xb0   :  { %232 = vsyncadd [#allocation5], 4294967040 }
  0xb1   :  { %130 = vsyncpa [#allocation4], 1 }
  0xb2   :  { %131 = vsyncpa [#allocation7], 1 }
  0xb3   :  { %132 = vsyncpa [#allocation5], 1 }

</bundles_post_ra>
